<compile_context>
chip_gen: v5e
topology: v5e:2x2
jax: 0.10.0
libtpu: 0.0.40
codegen_flags: <defaults>
</compile_context>

<pallas_src>
import functools

import jax
import jax.numpy as jnp
from jax import lax
from jax.experimental import pallas as pl
from jax.experimental.pallas import tpu as pltpu


def _cdiv(a, b):
    return -(-a // b)


def _round_up(a, b):
    return _cdiv(a, b) * b


# ----------------------------------------------------------------------------
# Kernel
# ----------------------------------------------------------------------------
def _cnn1d_kernel(x_ref,
                  w1_ref, f1_ref, w2_ref, f2_ref, w3_ref, f3_ref,
                  wfc_ref, bfc_ref, pool_ref,
                  out_ref,
                  y1_scr, y2_scr):
    bblk, t_pad, cin = x_ref.shape
    t1 = t_pad - 2                       # original sequence length
    m1 = bblk * t1                       # rows after conv1
    m2 = m1 // 2                         # rows after pool1

    def conv_bn_relu(prev, center, nxt, w_ref, f_ref):
        """Conv1d(k=3,s=1,p=1) with BN scale folded into w, bias+BN shift in f."""
        dt = w_ref.dtype
        y = jnp.dot(prev.astype(dt), w_ref[0], preferred_element_type=jnp.float32)
        y = y + jnp.dot(center.astype(dt), w_ref[1], preferred_element_type=jnp.float32)
        y = y + jnp.dot(nxt.astype(dt), w_ref[2], preferred_element_type=jnp.float32)
        return jnp.maximum(y + f_ref[...], 0.0)

    # Zero the 8 guard rows on each side of both scratches.  The shifted-tap
    # reads below touch them at the global boundaries; the boundary masks make
    # the values irrelevant, this just keeps everything deterministic.
    y1_scr[pl.ds(0, 8), :] = jnp.zeros((8, y1_scr.shape[1]), jnp.float32)
    y1_scr[pl.ds(m1 + 8, 8), :] = jnp.zeros((8, y1_scr.shape[1]), jnp.float32)
    y2_scr[pl.ds(0, 8), :] = jnp.zeros((8, y2_scr.shape[1]), jnp.float32)
    y2_scr[pl.ds(m2 + 8, 8), :] = jnp.zeros((8, y2_scr.shape[1]), jnp.float32)

    # ---- layer 1 ------------------------------------------------------------
    # The wrapper zero-padded one time step per example, so the three conv taps
    # are plain shifted loads (no masks / concatenates needed).
    a_prev = x_ref[:, pl.ds(0, t1), :].reshape(m1, cin)
    a_cent = x_ref[:, pl.ds(1, t1), :].reshape(m1, cin)
    a_next = x_ref[:, pl.ds(2, t1), :].reshape(m1, cin)
    y1 = conv_bn_relu(a_prev, a_cent, a_next, w1_ref, f1_ref)        # (m1, 64)
    y1_scr[pl.ds(8, m1), :] = y1

    def pooled_taps(s_ref, m_rows, t_len):
        """MaxPool1d(2) of the activation stored in s_ref (at sublane offset 8)
        fused with its +-1 time shifts via strided sublane reads.  The shifted
        taps are masked at per-example boundaries."""
        half = m_rows // 2

        def rd(off):
            return jnp.maximum(
                s_ref[pl.ds(8 + off, half, stride=2), :],
                s_ref[pl.ds(9 + off, half, stride=2), :])

        center = rd(0)
        prev = rd(-2)
        nxt = rd(2)
        tpos = lax.broadcasted_iota(jnp.int32, (half, 1), 0) % t_len
        prev = jnp.where(tpos == 0, 0.0, prev)
        nxt = jnp.where(tpos == t_len - 1, 0.0, nxt)
        return prev, center, nxt

    # ---- layer 2 ------------------------------------------------------------
    p_prev, p_cent, p_next = pooled_taps(y1_scr, m1, t1 // 2)
    y2 = conv_bn_relu(p_prev, p_cent, p_next, w2_ref, f2_ref)        # (m2, 128)
    y2_scr[pl.ds(8, m2), :] = y2

    # ---- layer 3 ------------------------------------------------------------
    q_prev, q_cent, q_next = pooled_taps(y2_scr, m2, t1 // 4)
    y3 = conv_bn_relu(q_prev, q_cent, q_next, w3_ref, f3_ref)        # (m1//4, 256)

    # ---- AdaptiveAvgPool1d(1) as a segmented-mean matmul, then Linear --------
    h = jnp.dot(pool_ref[...], y3, preferred_element_type=jnp.float32)     # (bblk, 256)
    logits = jnp.dot(h.astype(wfc_ref.dtype), wfc_ref[...],
                     preferred_element_type=jnp.float32) + bfc_ref[...]    # (bblk, ncp)
    out_ref[0] = logits.astype(out_ref.dtype)


# ----------------------------------------------------------------------------
# Wrapper
# ----------------------------------------------------------------------------
def _const_spec(arr):
    nd = arr.ndim
    return pl.BlockSpec(arr.shape, lambda b, _nd=nd: (0,) * _nd)


@functools.partial(jax.jit, static_argnames=("compute_dtype",))
def cnn1d_forward(x, params, *, compute_dtype=jnp.float32):
    """x: (B, input_channels, T) float32  ->  (B, num_classes) float32."""
    B, cin, T = x.shape
    assert T % 4 == 0, "T must be divisible by 4 (two MaxPool1d(2) stages)"
    num_classes = params["fc_w"].shape[1]
    ncp = _round_up(num_classes, 128)           # lane-dense (padded) logits width

    # Batch-block size: fill the MXU (target ~256 rows per step) but keep the
    # grid >= 2 steps when possible so v7x's two TensorCores both get work and
    # the step-(i+1) input DMA overlaps step-i compute.
    bblk = max(1, min(B, max(1, 256 // T)))
    if T % 8 != 0:
        bblk = 1                                # keep in-kernel reshapes layout-trivial
    if bblk > 1 and _cdiv(B, bblk) < 2:
        bblk = _cdiv(B, 2)
    nsteps = _cdiv(B, bblk)
    b_pad = nsteps * bblk

    # NCW -> NWC, zero-pad one time step per example on each side (conv padding),
    # and pad the batch up to a multiple of bblk.
    # TODO(synk): the NCW->NWC transpose is still a separate XLA op over HBM;
    #             fusing it into the kernel would save one input round trip.
    x_t = jnp.transpose(x, (0, 2, 1)).astype(jnp.float32)
    x_t = jnp.pad(x_t, ((0, b_pad - B), (1, 1), (0, 0)))

    # Fold BatchNorm (eval) + conv bias into the conv weights / a single shift.
    def conv_params(i):
        w = jnp.transpose(params[f"conv{i}_w"], (2, 1, 0)).astype(jnp.float32)  # (3,Cin,Cout)
        b = params[f"conv{i}_b"].astype(jnp.float32)
        scale = params[f"bn{i}_scale"].astype(jnp.float32)
        shift = params[f"bn{i}_shift"].astype(jnp.float32)
        w_fold = (w * scale[None, None, :]).astype(compute_dtype)
        f_fold = (shift + b * scale).reshape(1, -1).astype(jnp.float32)
        return [w_fold, f_fold]

    fc_w = jnp.zeros((256, ncp), compute_dtype).at[:, :num_classes].set(
        params["fc_w"].astype(compute_dtype))
    fc_b = jnp.zeros((1, ncp), jnp.float32).at[:, :num_classes].set(
        params["fc_b"].astype(jnp.float32))

    # Segmented-mean matrix for AdaptiveAvgPool1d(1): (bblk, bblk * T//4).
    t4 = T // 4
    pool_mat = jnp.repeat(jnp.eye(bblk, dtype=jnp.float32), t4, axis=1) / float(t4)

    flat = (conv_params(1) + conv_params(2) + conv_params(3)
            + [fc_w, fc_b, pool_mat])

    in_specs = [pl.BlockSpec((bblk, T + 2, cin), lambda b: (b, 0, 0))]
    in_specs += [_const_spec(p) for p in flat]
    out_specs = pl.BlockSpec((1, bblk, ncp), lambda b: (b, 0, 0))

    m1 = bblk * T
    grid_spec = pltpu.PrefetchScalarGridSpec(
        num_scalar_prefetch=0,
        grid=(nsteps,),
        in_specs=in_specs,
        out_specs=out_specs,
        scratch_shapes=[
            pltpu.VMEM((m1 + 16, 64), jnp.float32),        # conv1 out (+8 guard rows per side)
            pltpu.VMEM((m1 // 2 + 16, 128), jnp.float32),  # conv2 out (+8 guard rows per side)
        ],
    )

    out = pl.pallas_call(
        _cnn1d_kernel,
        out_shape=jax.ShapeDtypeStruct((nsteps, bblk, ncp), jnp.float32),
        grid_spec=grid_spec,
        compiler_params=pltpu.CompilerParams(
            dimension_semantics=("parallel",),
            vmem_limit_bytes=32 * 1024 * 1024),
    )(x_t, *flat)
    return out.reshape(b_pad, ncp)[:B, :num_classes]


# ----------------------------------------------------------------------------
# Deterministic parameter init (shapes follow the PyTorch module __init__)
# ----------------------------------------------------------------------------
def init_params(key, input_channels=40, num_classes=10):
    eps = 1e-5
    ks = list(jax.random.split(key, 11))
    params = {}

    def conv_init(kw, kb, cin, cout):
        w = jax.random.normal(kw, (cout, cin, 3), jnp.float32) / jnp.sqrt(3.0 * cin)
        b = 0.05 * jax.random.normal(kb, (cout,), jnp.float32)
        return w, b

    def bn_init(k, c):
        k1, k2, k3, k4 = jax.random.split(k, 4)
        gamma = 1.0 + 0.1 * jax.random.normal(k1, (c,), jnp.float32)
        beta = 0.1 * jax.random.normal(k2, (c,), jnp.float32)
        mean = 0.1 * jax.random.normal(k3, (c,), jnp.float32)
        var = jax.random.uniform(k4, (c,), jnp.float32, minval=0.5, maxval=1.5)
        scale = gamma / jnp.sqrt(var + eps)
        shift = beta - mean * scale
        return scale, shift

    chans = [(input_channels, 64), (64, 128), (128, 256)]
    for i, (cin, cout) in enumerate(chans, start=1):
        w, b = conv_init(ks[3 * (i - 1)], ks[3 * (i - 1) + 1], cin, cout)
        sc, sh = bn_init(ks[3 * (i - 1) + 2], cout)
        params[f"conv{i}_w"] = w
        params[f"conv{i}_b"] = b
        params[f"bn{i}_scale"] = sc
        params[f"bn{i}_shift"] = sh

    params["fc_w"] = jax.random.normal(ks[9], (256, num_classes), jnp.float32) / jnp.sqrt(256.0)
    params["fc_b"] = 0.05 * jax.random.normal(ks[10], (num_classes,), jnp.float32)
    return params


# ----------------------------------------------------------------------------
# Pure-JAX reference (matches PyTorch forward, BatchNorm in eval mode)
# ----------------------------------------------------------------------------
def ref_forward(x, params):
    def conv1d(x, w, b):
        y = jax.lax.conv_general_dilated(
            x, w, window_strides=(1,), padding=[(1, 1)],
            dimension_numbers=("NCH", "OIH", "NCH"))
        return y + b[None, :, None]

    def bn_relu(x, scale, shift):
        return jnp.maximum(x * scale[None, :, None] + shift[None, :, None], 0.0)

    def maxpool2(x):
        B, C, T = x.shape
        return x.reshape(B, C, T // 2, 2).max(axis=-1)

    y = bn_relu(conv1d(x, params["conv1_w"], params["conv1_b"]),
                params["bn1_scale"], params["bn1_shift"])
    y = maxpool2(y)
    y = bn_relu(conv1d(y, params["conv2_w"], params["conv2_b"]),
                params["bn2_scale"], params["bn2_shift"])
    y = maxpool2(y)
    y = bn_relu(conv1d(y, params["conv3_w"], params["conv3_b"]),
                params["bn3_scale"], params["bn3_shift"])
    h = jnp.mean(y, axis=-1)                      # AdaptiveAvgPool1d(1) + flatten
    return h @ params["fc_w"] + params["fc_b"]


if __name__ == "__main__":
    key = jax.random.PRNGKey(0)
    pkey, xkey = jax.random.split(key)

    B, CIN, T, NUM_CLASSES = 2, 40, 16, 10
    params = init_params(pkey, input_channels=CIN, num_classes=NUM_CLASSES)
    x = jax.random.normal(xkey, (B, CIN, T), jnp.float32)

    out = cnn1d_forward(x, params)
    out = jax.block_until_ready(out)

    ref = ref_forward(x, params)
    assert out.shape == (B, NUM_CLASSES), out.shape
    assert jnp.allclose(out, ref, atol=1e-4, rtol=1e-4), (out, ref)

    print("KERNEL_OK")
</pallas_src>

<mosaic_0001>
module attributes {stable_mosaic.version = 11 : i64} {
  func.func @_cnn1d_kernel(%arg0: i32, %arg1: memref<1x18x40xf32, #tpu.memory_space<vmem>>, %arg2: memref<3x40x64xf32, #tpu.memory_space<vmem>>, %arg3: memref<1x64xf32, #tpu.memory_space<vmem>>, %arg4: memref<3x64x128xf32, #tpu.memory_space<vmem>>, %arg5: memref<1x128xf32, #tpu.memory_space<vmem>>, %arg6: memref<3x128x256xf32, #tpu.memory_space<vmem>>, %arg7: memref<1x256xf32, #tpu.memory_space<vmem>>, %arg8: memref<256x128xf32, #tpu.memory_space<vmem>>, %arg9: memref<1x128xf32, #tpu.memory_space<vmem>>, %arg10: memref<1x4xf32, #tpu.memory_space<vmem>>, %arg11: memref<1x1x128xf32, #tpu.memory_space<vmem>>, %arg12: memref<32x64xf32, #tpu.memory_space<vmem>>, %arg13: memref<24x128xf32, #tpu.memory_space<vmem>>) attributes {dimension_semantics = [#tpu.dimension_semantics<parallel>], iteration_bounds = array<i64: 2>, scalar_prefetch = 0 : i64, scratch_operands = 2 : i64, tpu.core_type = #tpu.core_type<tc>, window_params = [{transform_indices = @transform_0, window_bounds = array<i64: 1, 18, 40>}, {pipeline_mode = #tpu.pipeline_mode<synchronous>, transform_indices = @transform_1, window_bounds = array<i64: 3, 40, 64>}, {pipeline_mode = #tpu.pipeline_mode<synchronous>, transform_indices = @transform_2, window_bounds = array<i64: 1, 64>}, {pipeline_mode = #tpu.pipeline_mode<synchronous>, transform_indices = @transform_3, window_bounds = array<i64: 3, 64, 128>}, {pipeline_mode = #tpu.pipeline_mode<synchronous>, transform_indices = @transform_4, window_bounds = array<i64: 1, 128>}, {pipeline_mode = #tpu.pipeline_mode<synchronous>, transform_indices = @transform_5, window_bounds = array<i64: 3, 128, 256>}, {pipeline_mode = #tpu.pipeline_mode<synchronous>, transform_indices = @transform_6, window_bounds = array<i64: 1, 256>}, {pipeline_mode = #tpu.pipeline_mode<synchronous>, transform_indices = @transform_7, window_bounds = array<i64: 256, 128>}, {pipeline_mode = #tpu.pipeline_mode<synchronous>, transform_indices = @transform_8, window_bounds = array<i64: 1, 128>}, {pipeline_mode = #tpu.pipeline_mode<synchronous>, transform_indices = @transform_9, window_bounds = array<i64: 1, 4>}, {transform_indices = @transform_10, window_bounds = array<i64: 1, 1, 128>}]} {
    %cst = arith.constant 0.000000e+00 : f32
    %0 = vector.broadcast %cst : f32 to vector<8x64xf32>
    %c0 = arith.constant 0 : index
    %c0_0 = arith.constant 0 : index
    %1 = vector.load %arg12[%c0, %c0_0] : memref<32x64xf32, #tpu.memory_space<vmem>>, vector<8x64xf32>
    tpu.vector_store %arg12[%c0, %c0_0], %0 {strides = array<i32>} : memref<32x64xf32, #tpu.memory_space<vmem>>, vector<8x64xf32>,
    %cst_1 = arith.constant 0.000000e+00 : f32
    %2 = vector.broadcast %cst_1 : f32 to vector<8x64xf32>
    %c24 = arith.constant 24 : index
    %c0_2 = arith.constant 0 : index
    %3 = vector.load %arg12[%c24, %c0_2] : memref<32x64xf32, #tpu.memory_space<vmem>>, vector<8x64xf32>
    tpu.vector_store %arg12[%c24, %c0_2], %2 {strides = array<i32>} : memref<32x64xf32, #tpu.memory_space<vmem>>, vector<8x64xf32>,
    %cst_3 = arith.constant 0.000000e+00 : f32
    %4 = vector.broadcast %cst_3 : f32 to vector<8x128xf32>
    %c0_4 = arith.constant 0 : index
    %c0_5 = arith.constant 0 : index
    %5 = vector.load %arg13[%c0_4, %c0_5] : memref<24x128xf32, #tpu.memory_space<vmem>>, vector<8x128xf32>
    tpu.vector_store %arg13[%c0_4, %c0_5], %4 {strides = array<i32>} : memref<24x128xf32, #tpu.memory_space<vmem>>, vector<8x128xf32>,
    %cst_6 = arith.constant 0.000000e+00 : f32
    %6 = vector.broadcast %cst_6 : f32 to vector<8x128xf32>
    %c16 = arith.constant 16 : index
    %c0_7 = arith.constant 0 : index
    %7 = vector.load %arg13[%c16, %c0_7] : memref<24x128xf32, #tpu.memory_space<vmem>>, vector<8x128xf32>
    tpu.vector_store %arg13[%c16, %c0_7], %6 {strides = array<i32>} : memref<24x128xf32, #tpu.memory_space<vmem>>, vector<8x128xf32>,
    %c0_8 = arith.constant 0 : index
    %c0_9 = arith.constant 0 : index
    %c0_10 = arith.constant 0 : index
    %8 = vector.load %arg1[%c0_8, %c0_9, %c0_10] : memref<1x18x40xf32, #tpu.memory_space<vmem>>, vector<1x16x40xf32>
    %9 = vector.shape_cast %8 : vector<1x16x40xf32> to vector<16x40xf32>
    %c0_11 = arith.constant 0 : index
    %c1 = arith.constant 1 : index
    %c0_12 = arith.constant 0 : index
    %10 = vector.load %arg1[%c0_11, %c1, %c0_12] : memref<1x18x40xf32, #tpu.memory_space<vmem>>, vector<1x16x40xf32>
    %11 = vector.shape_cast %10 : vector<1x16x40xf32> to vector<16x40xf32>
    %c0_13 = arith.constant 0 : index
    %c2 = arith.constant 2 : index
    %c0_14 = arith.constant 0 : index
    %12 = vector.load %arg1[%c0_13, %c2, %c0_14] : memref<1x18x40xf32, #tpu.memory_space<vmem>>, vector<1x16x40xf32>
    %13 = vector.shape_cast %12 : vector<1x16x40xf32> to vector<16x40xf32>
    %c0_15 = arith.constant 0 : index
    %c0_16 = arith.constant 0 : index
    %c0_17 = arith.constant 0 : index
    %14 = vector.load %arg2[%c0_15, %c0_16, %c0_17] : memref<3x40x64xf32, #tpu.memory_space<vmem>>, vector<1x40x64xf32>
    %15 = vector.shape_cast %14 : vector<1x40x64xf32> to vector<40x64xf32>
    %cst_18 = arith.constant dense<0.000000e+00> : vector<16x64xf32>
    %16 = tpu.matmul %9, %15, %cst_18 {dimension_numbers = #tpu.dot_dimension_numbers<[1], [0], [0], [1], [0, 0, 1, 1], [], []>} : vector<16x40xf32>, vector<40x64xf32>, vector<16x64xf32> -> vector<16x64xf32>
    %c1_19 = arith.constant 1 : index
    %c0_20 = arith.constant 0 : index
    %c0_21 = arith.constant 0 : index
    %17 = vector.load %arg2[%c1_19, %c0_20, %c0_21] : memref<3x40x64xf32, #tpu.memory_space<vmem>>, vector<1x40x64xf32>
    %18 = vector.shape_cast %17 : vector<1x40x64xf32> to vector<40x64xf32>
    %cst_22 = arith.constant dense<0.000000e+00> : vector<16x64xf32>
    %19 = tpu.matmul %11, %18, %cst_22 {dimension_numbers = #tpu.dot_dimension_numbers<[1], [0], [0], [1], [0, 0, 1, 1], [], []>} : vector<16x40xf32>, vector<40x64xf32>, vector<16x64xf32> -> vector<16x64xf32>
    %20 = arith.addf %16, %19 : vector<16x64xf32>
    %c2_23 = arith.constant 2 : index
    %c0_24 = arith.constant 0 : index
    %c0_25 = arith.constant 0 : index
    %21 = vector.load %arg2[%c2_23, %c0_24, %c0_25] : memref<3x40x64xf32, #tpu.memory_space<vmem>>, vector<1x40x64xf32>
    %22 = vector.shape_cast %21 : vector<1x40x64xf32> to vector<40x64xf32>
    %cst_26 = arith.constant dense<0.000000e+00> : vector<16x64xf32>
    %23 = tpu.matmul %13, %22, %cst_26 {dimension_numbers = #tpu.dot_dimension_numbers<[1], [0], [0], [1], [0, 0, 1, 1], [], []>} : vector<16x40xf32>, vector<40x64xf32>, vector<16x64xf32> -> vector<16x64xf32>
    %24 = arith.addf %20, %23 : vector<16x64xf32>
    %c0_27 = arith.constant 0 : index
    %c0_28 = arith.constant 0 : index
    %25 = vector.load %arg3[%c0_27, %c0_28] : memref<1x64xf32, #tpu.memory_space<vmem>>, vector<1x64xf32>
    %26 = vector.broadcast %25 : vector<1x64xf32> to vector<16x64xf32>
    %27 = arith.addf %24, %26 : vector<16x64xf32>
    %cst_29 = arith.constant 0.000000e+00 : f32
    %28 = vector.broadcast %cst_29 : f32 to vector<16x64xf32>
    %29 = arith.maximumf %27, %28 : vector<16x64xf32>
    %c8 = arith.constant 8 : index
    %c0_30 = arith.constant 0 : index
    %30 = vector.load %arg12[%c8, %c0_30] : memref<32x64xf32, #tpu.memory_space<vmem>>, vector<16x64xf32>
    tpu.vector_store %arg12[%c8, %c0_30], %29 {strides = array<i32>} : memref<32x64xf32, #tpu.memory_space<vmem>>, vector<16x64xf32>,
    %c8_31 = arith.constant 8 : index
    %c0_32 = arith.constant 0 : index
    %31 = tpu.strided_load %arg12[%c8_31, %c0_32] {strides = array<i32: 2, 1>} : memref<32x64xf32, #tpu.memory_space<vmem>>, vector<8x64xf32>
    %c9 = arith.constant 9 : index
    %c0_33 = arith.constant 0 : index
    %32 = tpu.strided_load %arg12[%c9, %c0_33] {strides = array<i32: 2, 1>} : memref<32x64xf32, #tpu.memory_space<vmem>>, vector<8x64xf32>
    %33 = arith.maximumf %31, %32 : vector<8x64xf32>
    %c6 = arith.constant 6 : index
    %c0_34 = arith.constant 0 : index
    %34 = tpu.strided_load %arg12[%c6, %c0_34] {strides = array<i32: 2, 1>} : memref<32x64xf32, #tpu.memory_space<vmem>>, vector<8x64xf32>
    %c7 = arith.constant 7 : index
    %c0_35 = arith.constant 0 : index
    %35 = tpu.strided_load %arg12[%c7, %c0_35] {strides = array<i32: 2, 1>} : memref<32x64xf32, #tpu.memory_space<vmem>>, vector<8x64xf32>
    %36 = arith.maximumf %34, %35 : vector<8x64xf32>
    %c10 = arith.constant 10 : index
    %c0_36 = arith.constant 0 : index
    %37 = tpu.strided_load %arg12[%c10, %c0_36] {strides = array<i32: 2, 1>} : memref<32x64xf32, #tpu.memory_space<vmem>>, vector<8x64xf32>
    %c11 = arith.constant 11 : index
    %c0_37 = arith.constant 0 : index
    %38 = tpu.strided_load %arg12[%c11, %c0_37] {strides = array<i32: 2, 1>} : memref<32x64xf32, #tpu.memory_space<vmem>>, vector<8x64xf32>
    %39 = arith.maximumf %37, %38 : vector<8x64xf32>
    %40 = tpu.iota {dimensions = array<i32: 0>} : vector<8x1xi32>
    %c8_i32 = arith.constant 8 : i32
    %c0_i32 = arith.constant 0 : i32
    %41 = arith.cmpi eq, %c8_i32, %c0_i32 : i32
    %c1_i32 = arith.constant 1 : i32
    %42 = arith.select %41, %c1_i32, %c8_i32 : i32
    %43 = vector.broadcast %42 : i32 to vector<8x1xi32>
    %44 = arith.remsi %40, %43 : vector<8x1xi32>
    %c0_i32_38 = arith.constant 0 : i32
    %45 = vector.broadcast %c0_i32_38 : i32 to vector<8x1xi32>
    %46 = arith.cmpi ne, %44, %45 : vector<8x1xi32>
    %c0_i32_39 = arith.constant 0 : i32
    %47 = vector.broadcast %c0_i32_39 : i32 to vector<8x1xi32>
    %48 = arith.cmpi slt, %44, %47 : vector<8x1xi32>
    %c0_i32_40 = arith.constant 0 : i32
    %49 = arith.cmpi slt, %42, %c0_i32_40 : i32
    %50 = vector.broadcast %49 : i1 to vector<8x1xi1>
    %51 = vector.broadcast %50 : vector<8x1xi1> to vector<8x1xi1>
    %52 = arith.xori %48, %51 : vector<8x1xi1>
    %53 = arith.andi %52, %46 : vector<8x1xi1>
    %54 = vector.broadcast %42 : i32 to vector<8x1xi32>
    %55 = arith.addi %44, %54 : vector<8x1xi32>
    %56 = arith.select %53, %55, %44 : vector<8x1xi1>, vector<8x1xi32>
    %c0_i32_41 = arith.constant 0 : i32
    %57 = vector.broadcast %c0_i32_41 : i32 to vector<8x1xi32>
    %58 = arith.cmpi eq, %56, %57 : vector<8x1xi32>
    %cst_42 = arith.constant 0.000000e+00 : f32
    %59 = vector.shape_cast %58 : vector<8x1xi1> to vector<8x1xi1>
    %60 = vector.broadcast %59 : vector<8x1xi1> to vector<8x64xi1>
    %61 = vector.broadcast %cst_42 : f32 to vector<8x64xf32>
    %62 = arith.select %60, %61, %36 : vector<8x64xi1>, vector<8x64xf32>
    %c7_i32 = arith.constant 7 : i32
    %63 = vector.broadcast %c7_i32 : i32 to vector<8x1xi32>
    %64 = arith.cmpi eq, %56, %63 : vector<8x1xi32>
    %cst_43 = arith.constant 0.000000e+00 : f32
    %65 = vector.shape_cast %64 : vector<8x1xi1> to vector<8x1xi1>
    %66 = vector.broadcast %65 : vector<8x1xi1> to vector<8x64xi1>
    %67 = vector.broadcast %cst_43 : f32 to vector<8x64xf32>
    %68 = arith.select %66, %67, %39 : vector<8x64xi1>, vector<8x64xf32>
    %c0_44 = arith.constant 0 : index
    %c0_45 = arith.constant 0 : index
    %c0_46 = arith.constant 0 : index
    %69 = vector.load %arg4[%c0_44, %c0_45, %c0_46] : memref<3x64x128xf32, #tpu.memory_space<vmem>>, vector<1x64x128xf32>
    %70 = vector.shape_cast %69 : vector<1x64x128xf32> to vector<64x128xf32>
    %cst_47 = arith.constant dense<0.000000e+00> : vector<8x128xf32>
    %71 = tpu.matmul %62, %70, %cst_47 {dimension_numbers = #tpu.dot_dimension_numbers<[1], [0], [0], [1], [0, 0, 1, 1], [], []>} : vector<8x64xf32>, vector<64x128xf32>, vector<8x128xf32> -> vector<8x128xf32>
    %c1_48 = arith.constant 1 : index
    %c0_49 = arith.constant 0 : index
    %c0_50 = arith.constant 0 : index
    %72 = vector.load %arg4[%c1_48, %c0_49, %c0_50] : memref<3x64x128xf32, #tpu.memory_space<vmem>>, vector<1x64x128xf32>
    %73 = vector.shape_cast %72 : vector<1x64x128xf32> to vector<64x128xf32>
    %cst_51 = arith.constant dense<0.000000e+00> : vector<8x128xf32>
    %74 = tpu.matmul %33, %73, %cst_51 {dimension_numbers = #tpu.dot_dimension_numbers<[1], [0], [0], [1], [0, 0, 1, 1], [], []>} : vector<8x64xf32>, vector<64x128xf32>, vector<8x128xf32> -> vector<8x128xf32>
    %75 = arith.addf %71, %74 : vector<8x128xf32>
    %c2_52 = arith.constant 2 : index
    %c0_53 = arith.constant 0 : index
    %c0_54 = arith.constant 0 : index
    %76 = vector.load %arg4[%c2_52, %c0_53, %c0_54] : memref<3x64x128xf32, #tpu.memory_space<vmem>>, vector<1x64x128xf32>
    %77 = vector.shape_cast %76 : vector<1x64x128xf32> to vector<64x128xf32>
    %cst_55 = arith.constant dense<0.000000e+00> : vector<8x128xf32>
    %78 = tpu.matmul %68, %77, %cst_55 {dimension_numbers = #tpu.dot_dimension_numbers<[1], [0], [0], [1], [0, 0, 1, 1], [], []>} : vector<8x64xf32>, vector<64x128xf32>, vector<8x128xf32> -> vector<8x128xf32>
    %79 = arith.addf %75, %78 : vector<8x128xf32>
    %c0_56 = arith.constant 0 : index
    %c0_57 = arith.constant 0 : index
    %80 = vector.load %arg5[%c0_56, %c0_57] : memref<1x128xf32, #tpu.memory_space<vmem>>, vector<1x128xf32>
    %81 = vector.broadcast %80 : vector<1x128xf32> to vector<8x128xf32>
    %82 = arith.addf %79, %81 : vector<8x128xf32>
    %cst_58 = arith.constant 0.000000e+00 : f32
    %83 = vector.broadcast %cst_58 : f32 to vector<8x128xf32>
    %84 = arith.maximumf %82, %83 : vector<8x128xf32>
    %c8_59 = arith.constant 8 : index
    %c0_60 = arith.constant 0 : index
    %85 = vector.load %arg13[%c8_59, %c0_60] : memref<24x128xf32, #tpu.memory_space<vmem>>, vector<8x128xf32>
    tpu.vector_store %arg13[%c8_59, %c0_60], %84 {strides = array<i32>} : memref<24x128xf32, #tpu.memory_space<vmem>>, vector<8x128xf32>,
    %c8_61 = arith.constant 8 : index
    %c0_62 = arith.constant 0 : index
    %86 = tpu.strided_load %arg13[%c8_61, %c0_62] {strides = array<i32: 2, 1>} : memref<24x128xf32, #tpu.memory_space<vmem>>, vector<4x128xf32>
    %c9_63 = arith.constant 9 : index
    %c0_64 = arith.constant 0 : index
    %87 = tpu.strided_load %arg13[%c9_63, %c0_64] {strides = array<i32: 2, 1>} : memref<24x128xf32, #tpu.memory_space<vmem>>, vector<4x128xf32>
    %88 = arith.maximumf %86, %87 : vector<4x128xf32>
    %c6_65 = arith.constant 6 : index
    %c0_66 = arith.constant 0 : index
    %89 = tpu.strided_load %arg13[%c6_65, %c0_66] {strides = array<i32: 2, 1>} : memref<24x128xf32, #tpu.memory_space<vmem>>, vector<4x128xf32>
    %c7_67 = arith.constant 7 : index
    %c0_68 = arith.constant 0 : index
    %90 = tpu.strided_load %arg13[%c7_67, %c0_68] {strides = array<i32: 2, 1>} : memref<24x128xf32, #tpu.memory_space<vmem>>, vector<4x128xf32>
    %91 = arith.maximumf %89, %90 : vector<4x128xf32>
    %c10_69 = arith.constant 10 : index
    %c0_70 = arith.constant 0 : index
    %92 = tpu.strided_load %arg13[%c10_69, %c0_70] {strides = array<i32: 2, 1>} : memref<24x128xf32, #tpu.memory_space<vmem>>, vector<4x128xf32>
    %c11_71 = arith.constant 11 : index
    %c0_72 = arith.constant 0 : index
    %93 = tpu.strided_load %arg13[%c11_71, %c0_72] {strides = array<i32: 2, 1>} : memref<24x128xf32, #tpu.memory_space<vmem>>, vector<4x128xf32>
    %94 = arith.maximumf %92, %93 : vector<4x128xf32>
    %95 = tpu.iota {dimensions = array<i32: 0>} : vector<4x1xi32>
    %c4_i32 = arith.constant 4 : i32
    %c0_i32_73 = arith.constant 0 : i32
    %96 = arith.cmpi eq, %c4_i32, %c0_i32_73 : i32
    %c1_i32_74 = arith.constant 1 : i32
    %97 = arith.select %96, %c1_i32_74, %c4_i32 : i32
    %98 = vector.broadcast %97 : i32 to vector<4x1xi32>
    %99 = arith.remsi %95, %98 : vector<4x1xi32>
    %c0_i32_75 = arith.constant 0 : i32
    %100 = vector.broadcast %c0_i32_75 : i32 to vector<4x1xi32>
    %101 = arith.cmpi ne, %99, %100 : vector<4x1xi32>
    %c0_i32_76 = arith.constant 0 : i32
    %102 = vector.broadcast %c0_i32_76 : i32 to vector<4x1xi32>
    %103 = arith.cmpi slt, %99, %102 : vector<4x1xi32>
    %c0_i32_77 = arith.constant 0 : i32
    %104 = arith.cmpi slt, %97, %c0_i32_77 : i32
    %105 = vector.broadcast %104 : i1 to vector<4x1xi1>
    %106 = vector.broadcast %105 : vector<4x1xi1> to vector<4x1xi1>
    %107 = arith.xori %103, %106 : vector<4x1xi1>
    %108 = arith.andi %107, %101 : vector<4x1xi1>
    %109 = vector.broadcast %97 : i32 to vector<4x1xi32>
    %110 = arith.addi %99, %109 : vector<4x1xi32>
    %111 = arith.select %108, %110, %99 : vector<4x1xi1>, vector<4x1xi32>
    %c0_i32_78 = arith.constant 0 : i32
    %112 = vector.broadcast %c0_i32_78 : i32 to vector<4x1xi32>
    %113 = arith.cmpi eq, %111, %112 : vector<4x1xi32>
    %cst_79 = arith.constant 0.000000e+00 : f32
    %114 = vector.shape_cast %113 : vector<4x1xi1> to vector<4x1xi1>
    %115 = vector.broadcast %114 : vector<4x1xi1> to vector<4x128xi1>
    %116 = vector.broadcast %cst_79 : f32 to vector<4x128xf32>
    %117 = arith.select %115, %116, %91 : vector<4x128xi1>, vector<4x128xf32>
    %c3_i32 = arith.constant 3 : i32
    %118 = vector.broadcast %c3_i32 : i32 to vector<4x1xi32>
    %119 = arith.cmpi eq, %111, %118 : vector<4x1xi32>
    %cst_80 = arith.constant 0.000000e+00 : f32
    %120 = vector.shape_cast %119 : vector<4x1xi1> to vector<4x1xi1>
    %121 = vector.broadcast %120 : vector<4x1xi1> to vector<4x128xi1>
    %122 = vector.broadcast %cst_80 : f32 to vector<4x128xf32>
    %123 = arith.select %121, %122, %94 : vector<4x128xi1>, vector<4x128xf32>
    %c0_81 = arith.constant 0 : index
    %c0_82 = arith.constant 0 : index
    %c0_83 = arith.constant 0 : index
    %124 = vector.load %arg6[%c0_81, %c0_82, %c0_83] : memref<3x128x256xf32, #tpu.memory_space<vmem>>, vector<1x128x256xf32>
    %125 = vector.shape_cast %124 : vector<1x128x256xf32> to vector<128x256xf32>
    %cst_84 = arith.constant dense<0.000000e+00> : vector<4x256xf32>
    %126 = tpu.matmul %117, %125, %cst_84 {dimension_numbers = #tpu.dot_dimension_numbers<[1], [0], [0], [1], [0, 0, 1, 1], [], []>} : vector<4x128xf32>, vector<128x256xf32>, vector<4x256xf32> -> vector<4x256xf32>
    %c1_85 = arith.constant 1 : index
    %c0_86 = arith.constant 0 : index
    %c0_87 = arith.constant 0 : index
    %127 = vector.load %arg6[%c1_85, %c0_86, %c0_87] : memref<3x128x256xf32, #tpu.memory_space<vmem>>, vector<1x128x256xf32>
    %128 = vector.shape_cast %127 : vector<1x128x256xf32> to vector<128x256xf32>
    %cst_88 = arith.constant dense<0.000000e+00> : vector<4x256xf32>
    %129 = tpu.matmul %88, %128, %cst_88 {dimension_numbers = #tpu.dot_dimension_numbers<[1], [0], [0], [1], [0, 0, 1, 1], [], []>} : vector<4x128xf32>, vector<128x256xf32>, vector<4x256xf32> -> vector<4x256xf32>
    %130 = arith.addf %126, %129 : vector<4x256xf32>
    %c2_89 = arith.constant 2 : index
    %c0_90 = arith.constant 0 : index
    %c0_91 = arith.constant 0 : index
    %131 = vector.load %arg6[%c2_89, %c0_90, %c0_91] : memref<3x128x256xf32, #tpu.memory_space<vmem>>, vector<1x128x256xf32>
    %132 = vector.shape_cast %131 : vector<1x128x256xf32> to vector<128x256xf32>
    %cst_92 = arith.constant dense<0.000000e+00> : vector<4x256xf32>
    %133 = tpu.matmul %123, %132, %cst_92 {dimension_numbers = #tpu.dot_dimension_numbers<[1], [0], [0], [1], [0, 0, 1, 1], [], []>} : vector<4x128xf32>, vector<128x256xf32>, vector<4x256xf32> -> vector<4x256xf32>
    %134 = arith.addf %130, %133 : vector<4x256xf32>
    %c0_93 = arith.constant 0 : index
    %c0_94 = arith.constant 0 : index
    %135 = vector.load %arg7[%c0_93, %c0_94] : memref<1x256xf32, #tpu.memory_space<vmem>>, vector<1x256xf32>
    %136 = vector.broadcast %135 : vector<1x256xf32> to vector<4x256xf32>
    %137 = arith.addf %134, %136 : vector<4x256xf32>
    %cst_95 = arith.constant 0.000000e+00 : f32
    %138 = vector.broadcast %cst_95 : f32 to vector<4x256xf32>
    %139 = arith.maximumf %137, %138 : vector<4x256xf32>
    %c0_96 = arith.constant 0 : index
    %c0_97 = arith.constant 0 : index
    %140 = vector.load %arg10[%c0_96, %c0_97] : memref<1x4xf32, #tpu.memory_space<vmem>>, vector<1x4xf32>
    %cst_98 = arith.constant dense<0.000000e+00> : vector<1x256xf32>
    %141 = tpu.matmul %140, %139, %cst_98 {dimension_numbers = #tpu.dot_dimension_numbers<[1], [0], [0], [1], [0, 0, 1, 1], [], []>} : vector<1x4xf32>, vector<4x256xf32>, vector<1x256xf32> -> vector<1x256xf32>
    %c0_99 = arith.constant 0 : index
    %c0_100 = arith.constant 0 : index
    %142 = vector.load %arg8[%c0_99, %c0_100] : memref<256x128xf32, #tpu.memory_space<vmem>>, vector<256x128xf32>
    %cst_101 = arith.constant dense<0.000000e+00> : vector<1x128xf32>
    %143 = tpu.matmul %141, %142, %cst_101 {dimension_numbers = #tpu.dot_dimension_numbers<[1], [0], [0], [1], [0, 0, 1, 1], [], []>} : vector<1x256xf32>, vector<256x128xf32>, vector<1x128xf32> -> vector<1x128xf32>
    %c0_102 = arith.constant 0 : index
    %c0_103 = arith.constant 0 : index
    %144 = vector.load %arg9[%c0_102, %c0_103] : memref<1x128xf32, #tpu.memory_space<vmem>>, vector<1x128xf32>
    %145 = arith.addf %143, %144 : vector<1x128xf32>
    %c0_104 = arith.constant 0 : index
    %c0_105 = arith.constant 0 : index
    %c0_106 = arith.constant 0 : index
    %146 = vector.load %arg11[%c0_104, %c0_105, %c0_106] : memref<1x1x128xf32, #tpu.memory_space<vmem>>, vector<1x1x128xf32>
    %147 = vector.shape_cast %146 : vector<1x1x128xf32> to vector<1x128xf32>
    %148 = vector.shape_cast %145 : vector<1x128xf32> to vector<1x1x128xf32>
    tpu.vector_store %arg11[%c0_104, %c0_105, %c0_106], %148 {strides = array<i32>} : memref<1x1x128xf32, #tpu.memory_space<vmem>>, vector<1x1x128xf32>,
    return
  }
  func.func @transform_0(%arg0: i32) -> (i32, i32, i32) {
    %c0_i32 = arith.constant 0 : i32
    %c0_i32_0 = arith.constant 0 : i32
    %c0_i32_1 = arith.constant 0 : i32
    return %arg0, %c0_i32, %c0_i32_0 : i32, i32, i32
  }
  func.func @transform_1(%arg0: i32) -> (i32, i32, i32) {
    %c0_i32 = arith.constant 0 : i32
    %c0_i32_0 = arith.constant 0 : i32
    %c0_i32_1 = arith.constant 0 : i32
    %c0_i32_2 = arith.constant 0 : i32
    return %c0_i32, %c0_i32_0, %c0_i32_1 : i32, i32, i32
  }
  func.func @transform_2(%arg0: i32) -> (i32, i32) {
    %c0_i32 = arith.constant 0 : i32
    %c0_i32_0 = arith.constant 0 : i32
    %c0_i32_1 = arith.constant 0 : i32
    return %c0_i32, %c0_i32_0 : i32, i32
  }
  func.func @transform_3(%arg0: i32) -> (i32, i32, i32) {
    %c0_i32 = arith.constant 0 : i32
    %c0_i32_0 = arith.constant 0 : i32
    %c0_i32_1 = arith.constant 0 : i32
    %c0_i32_2 = arith.constant 0 : i32
    return %c0_i32, %c0_i32_0, %c0_i32_1 : i32, i32, i32
  }
  func.func @transform_4(%arg0: i32) -> (i32, i32) {
    %c0_i32 = arith.constant 0 : i32
    %c0_i32_0 = arith.constant 0 : i32
    %c0_i32_1 = arith.constant 0 : i32
    return %c0_i32, %c0_i32_0 : i32, i32
  }
  func.func @transform_5(%arg0: i32) -> (i32, i32, i32) {
    %c0_i32 = arith.constant 0 : i32
    %c0_i32_0 = arith.constant 0 : i32
    %c0_i32_1 = arith.constant 0 : i32
    %c0_i32_2 = arith.constant 0 : i32
    return %c0_i32, %c0_i32_0, %c0_i32_1 : i32, i32, i32
  }
  func.func @transform_6(%arg0: i32) -> (i32, i32) {
    %c0_i32 = arith.constant 0 : i32
    %c0_i32_0 = arith.constant 0 : i32
    %c0_i32_1 = arith.constant 0 : i32
    return %c0_i32, %c0_i32_0 : i32, i32
  }
  func.func @transform_7(%arg0: i32) -> (i32, i32) {
    %c0_i32 = arith.constant 0 : i32
    %c0_i32_0 = arith.constant 0 : i32
    %c0_i32_1 = arith.constant 0 : i32
    return %c0_i32, %c0_i32_0 : i32, i32
  }
  func.func @transform_8(%arg0: i32) -> (i32, i32) {
    %c0_i32 = arith.constant 0 : i32
    %c0_i32_0 = arith.constant 0 : i32
    %c0_i32_1 = arith.constant 0 : i32
    return %c0_i32, %c0_i32_0 : i32, i32
  }
  func.func @transform_9(%arg0: i32) -> (i32, i32) {
    %c0_i32 = arith.constant 0 : i32
    %c0_i32_0 = arith.constant 0 : i32
    %c0_i32_1 = arith.constant 0 : i32
    return %c0_i32, %c0_i32_0 : i32, i32
  }
  func.func @transform_10(%arg0: i32) -> (i32, i32, i32) {
    %c0_i32 = arith.constant 0 : i32
    %c0_i32_0 = arith.constant 0 : i32
    %c0_i32_1 = arith.constant 0 : i32
    return %arg0, %c0_i32, %c0_i32_0 : i32, i32, i32
  }
}

</mosaic_0001>

<bundles_post_ra>
// kernel: cnn1d_forward.1
= control target key start
LH: loop header
LB: loop body
LE: loop exit
PB: predicated region body
PF: predicated region fallthrough
CT: control target
= control target key end

     0   :  { %15 = vsyncpa [#allocation5], 0  ;;  %s1997_s0 = inlined_call_operand.vmem [shape: f32[2,18,40], index: 0, kind: input, shape index: {}]   ;;  %s1998_s1 = inlined_call_operand.vmem [shape: f32[3,40,64], index: 1, kind: input, shape index: {}]   ;;  %s1999_s2 = inlined_call_operand.vmem [shape: f32[1,64], index: 2, kind: input, shape index: {}]   ;;  %s2000_s3 = inlined_call_operand.vmem [shape: f32[3,64,128], index: 3, kind: input, shape index: {}]   ;;  %s2001_s4 = inlined_call_operand.vmem [shape: f32[1,128], index: 4, kind: input, shape index: {}]   ;;  %s2002_s5 = inlined_call_operand.vmem [shape: f32[3,128,256], index: 5, kind: input, shape index: {}]   ;;  %s2003_s6 = inlined_call_operand.vmem [shape: f32[1,256], index: 6, kind: input, shape index: {}]   ;;  %s2004_s7 = inlined_call_operand.vmem [shape: f32[256,128], index: 7, kind: input, shape index: {}]   ;;  %s2005_s8 = inlined_call_operand.vmem [shape: f32[1,128], index: 8, kind: input, shape index: {}]   ;;  %s2006_s9 = inlined_call_operand.vmem [shape: f32[1,4], index: 9, kind: input, shape index: {}]   ;;  %s2007_s10 = inlined_call_operand.hbm [shape: f32[2,1,128], index: 10, kind: output, shape index: {}]  }
   0x1   :  { %17 = vsyncpa [#allocation5 + $0x1], 0  ;;  %s1367_s13 = smov 0   ;;  %s1369_s14 = smov 0  }
   0x2   :  { %s1371_s15 = smov 0   ;;  %s1373_s16 = smov 0  }
   0x3 LB: > { %s1388_s17 = sadd.s32 4294967295, %s1309_s16   ;;  %s1084_s18 = sadd.s32 4294967294, %s1309_s16   ;;  %s1309_s16 = sphi %s1373_s16, %s2019_s16   ;;  %s1305_s15 = sphi %s1371_s15, %s2018_s15   ;;  %s1301_s14 = sphi %s1369_s14, %s2017_s14   ;;  %s1297_s13 = sphi %s1367_s13, %s2016_s13  }
   0x4   : > { %s1392_s19 = sadd.s32 1, %s1309_s16   ;;  %s245_s20 = sadd.s32 1, %s1305_s15 }
   0x5   : > { %s242_s21 = ssub.s32 %s1309_s16, %s1392_s19  ;;  %p255_p0 = scmp.ne.s32.totalorder %s1305_s15, %s1301_s14 }
   0x6   : > { %p243_p1 = scmp.eq.s32.totalorder %s242_s21, 0  ;;  %p256_p2 = scmp.eq.s32.totalorder %s1388_s17, 1 }
   0x7   : > { %p261_p3 = scmp.ne.s32.totalorder %s1301_s14, %s1297_s13  ;;  %p262_p4 = scmp.eq.s32.totalorder %s1084_s18, 1 }
   0x8   : > { %s1403_s22 = scalar_select %p243_p1, %s1305_s15, %s245_s20  }
   0x9   : > { %p1405_p5 = por %p256_p2, %p255_p0  ;;  %p1409_p6 = por %p262_p4, %p261_p3 }
   0xa   : > { %2008 = sst [smem:[#allocation7_spill]] %s1403_s22  ;;  %p1087_p7 = scmp.ge.s32.totalorder %s1309_s16, 1 }
   0xb   : > { %p315_p8 = scmp.lt.s32.totalorder %s1309_s16, 3 }
   0xd   : > { %p316_p9 = pnand %p1087_p7, %p315_p8 }
   0xe   : > { %p352_p10 = scmp.lt.s32.totalorder (!%p316_p9), %s1388_s17, 1  ;;  %s350_s25 = sand.u32 (!%p316_p9), 1, %s1301_s14  }
   0xf   : > { %319 = sbr.rel (%p316_p9) target bundleno = 758 (0x2f6), region = 60  ;;  %s1025_s29 = scalar_lea.hbm (!%p316_p9), %s2007_s10, %s1388_s17 }
  0x10   : > { %s351_s22 = scalar_lea.vmem (!%p316_p9), [#allocation4], %s350_s25  ;;  %s1029_s12 = sshll.u32 (!%p316_p9), %s1025_s29, 4  ;;  %s1030_s12 = int_to_ptr.hbm [resolvable:$true] %s1029_s12 }
  0x11   : > { %s1017_s18 = scalar_lea.sflag (!%p316_p9), [#allocation5], %s350_s25  ;;  %s1261_s20 = sshra.s32 (!%p316_p9), %s1030_s12, 4  ;;  %s1262_s20 = int_to_ptr.hbm [resolvable:$true] %s1261_s20 }
  0x12   : > { %s1263_s21 = scalar_lea.hbm (!%p316_p9), %s1262_s20, 1  ;;  %s1267_s28 = scalar_lea.hbm (!%p316_p9), %s2007_s10, 2 }
  0x13   : > { %p1264_p11 = scmp.ne.s32.totalorder (!%p316_p9), %s1262_s20, %s1263_s21  ;;  %p1268_p0 = scmp.lt.s32.totalorder (!%p316_p9), %s1262_s20, %s2007_s10 }
  0x14   : > { %v1093_v0 = vld [vmem:[%s1998_s1 + $0x48] sm:$0xff]  ;;  %v372_v1 = vld [vmem:[%s1998_s1 + $0x20] sm:$0xff]  ;;  %v371_v3 = vld [vmem:[%s1998_s1 + $0x18] sm:$0xff]  ;;  %s353_s26 = scalar_select %p352_p10, %s1388_s17, 1  ;;  %vm379_vm0 = vcmask 326656   ;;  %vm357_vm1 = vcmask 523264  }
  0x15   : > { %v1092_v2 = vld [vmem:[%s1998_s1 + $0x40] sm:$0xff]  ;;  %397 = vmatpush.msra.mxu2 %v1093_v0  ;;  %426 = vmatpush.msra.mxu3 %v372_v1  ;;  %v1091_v4 = vld [vmem:[%s1998_s1 + $0x38] sm:$0xff]  ;;  %v370_v5 = vld [vmem:[%s1998_s1 + $0x10] sm:$0xff]  ;;  %v1311_v21 = vmov 0.0   ;;  %vm895_vm6 = vcmask 1043456   ;;  %vm891_vm7 = vcmask 31744   ;;  %p1265_p12 = pnand %p1264_p11, %p1405_p5  ;;  %p1269_p1 = scmp.lt.s32.totalorder %s1267_s28, %s1263_s21 }
  0x16   : > { %v1090_v6 = vld [vmem:[%s1998_s1 + $0x30] sm:$0xff]  ;;  %v369_v7 = vld [vmem:[%s1998_s1 + $0x8] sm:$0xff]  ;;  %s1204_s11 = smul.u32 24, %s353_s26  ;;  %v368_v9 = vld [vmem:[%s1998_s1] sm:$0xff]  ;;  %358 = vst.msk [vmem:[#allocation2] sm:$0xff] %vm357_vm1, %v1311_v21 }
  0x17   : > { %398 = vmatpush.msra.mxu2 %v1092_v2  ;;  %427 = vmatpush.msra.mxu3 %v371_v3  ;;  %v1089_v8 = vld [vmem:[%s1998_s1 + $0x28] sm:$0xff]  ;;  %v1102_v12 = vld [vmem:[%s1998_s1 + $0x70] sm:$0xff]  ;;  %v1100_v14 = vld [vmem:[%s1998_s1 + $0x60] sm:$0xff]  ;;  %359 = vst.msk [vmem:[#allocation2 + $0x18] sm:$0xff] %vm357_vm1, %v1311_v21  ;;  %p1266_p13 = pneg %p1265_p12  ;;  %p1270_p2 = por %p1269_p1, %p1268_p0 }
  0x18   : > { %s356_s27 = scalar_lea.vmem %s1997_s0, %s1204_s11  ;;  %v1101_v13 = vld [vmem:[%s1998_s1 + $0x68] sm:$0xff]  ;;  %v1099_v15 = vld [vmem:[%s1998_s1 + $0x58] sm:$0xff]  ;;  %v1098_v18 = vld [vmem:[%s1998_s1 + $0x50] sm:$0xff]  ;;  %360 = vst [vmem:[#allocation3] sm:$0xff] %v1311_v21  ;;  %s1027_s11 = sshll.u32 %s351_s22, 4  ;;  %s1028_s11 = int_to_ptr.vmem [resolvable:$true] %s1027_s11 }
  0x19   : > { %399 = vmatpush.msra.mxu2 %v1091_v4  ;;  %428 = vmatpush.msra.mxu3 %v370_v5  ;;  %v364_v10 = vld [vmem:[%s356_s27 + $0x1] sm:$0xff]  ;;  %v365_v16 = vld [vmem:[%s356_s27 + $0x9] sm:$0xff]  ;;  %361 = vst [vmem:[#allocation3 + $0x10] sm:$0xff] %v1311_v21  ;;  %v1112_v22 = vld [vmem:[%s2000_s3 + $0x78] sm:$0xff]  ;;  %p1271_p3 = pnand %p1270_p2, %p1266_p13 }
  0x1a   : > { %v362_v11 = vld [vmem:[%s356_s27] sm:$0xff]  ;;  %v363_v17 = vld [vmem:[%s356_s27 + $0x8] sm:$0xff]  ;;  %v529_v23 = vld [vmem:[%s2000_s3 + $0x38] sm:$0xff] }
  0x1b   : > { %400 = vmatpush.msra.mxu2 %v1090_v6  ;;  %429 = vmatpush.msra.mxu3 %v369_v7  ;;  %v366_v19 = vld [vmem:[%s356_s27 + $0x2] sm:$0xff]  ;;  %v367_v20 = vld [vmem:[%s356_s27 + $0xa] sm:$0xff]  ;;  %v1122_v24 = vld [vmem:[%s2000_s3 + $0xb8] sm:$0xff] }
  0x1c   : > { %573 = vmatpush.msra.mxu0 %v529_v23  ;;  %605 = vmatpush.msra.mxu1 %v1122_v24  ;;  %v1111_v25 = vld [vmem:[%s2000_s3 + $0x70] sm:$0xff]  ;;  %v1110_v28 = vld [vmem:[%s2000_s3 + $0x68] sm:$0xff]  ;;  %v1109_v31 = vld [vmem:[%s2000_s3 + $0x60] sm:$0xff] }
  0x1d   : > { %401 = vmatpush.msra.mxu2 %v1089_v8  ;;  %430 = vmatpush.msra.mxu3 %v368_v9  ;;  %v528_v26 = vld [vmem:[%s2000_s3 + $0x30] sm:$0xff]  ;;  %v527_v29 = vld [vmem:[%s2000_s3 + $0x28] sm:$0xff]  ;;  %v526_v32 = vld [vmem:[%s2000_s3 + $0x20] sm:$0xff] }
  0x1e   : > { %1094 = vmatmul.msk.f32.vlgmr.msra.gmra.mxu2 %vm379_vm0, %v364_v10  ;;  %1096 = vmatmul.msk.f32.vlgmr.msra.gmra.mxu3 %vm379_vm0, %v362_v11  ;;  %v1121_v27 = vld [vmem:[%s2000_s3 + $0xb0] sm:$0xff]  ;;  %v1120_v30 = vld [vmem:[%s2000_s3 + $0xa8] sm:$0xff]  ;;  %v1119_v33 = vld [vmem:[%s2000_s3 + $0xa0] sm:$0xff] }
  0x1f   : > { %461 = vmatpush.msrb.mxu2 %v1102_v12  ;;  %550 = vmatpush.msrb.mxu3 %v1112_v22  ;;  %v1108_v35 = vld [vmem:[%s2000_s3 + $0x58] sm:$0xff]  ;;  %v1107_v38 = vld [vmem:[%s2000_s3 + $0x50] sm:$0xff]  ;;  %v1106_v41 = vld [vmem:[%s2000_s3 + $0x48] sm:$0xff] }
  0x20   : > { %574 = vmatpush.msra.mxu0 %v528_v26  ;;  %606 = vmatpush.msra.mxu1 %v1121_v27  ;;  %v525_v36 = vld [vmem:[%s2000_s3 + $0x18] sm:$0xff]  ;;  %v524_v39 = vld [vmem:[%s2000_s3 + $0x10] sm:$0xff]  ;;  %v523_v42 = vld [vmem:[%s2000_s3 + $0x8] sm:$0xff] }
  0x21   : > { %462 = vmatpush.msrb.mxu2 %v1101_v13  ;;  %551 = vmatpush.msrb.mxu3 %v1111_v25  ;;  %v1118_v37 = vld [vmem:[%s2000_s3 + $0x98] sm:$0xff]  ;;  %v1117_v40 = vld [vmem:[%s2000_s3 + $0x90] sm:$0xff]  ;;  %v1116_v43 = vld [vmem:[%s2000_s3 + $0x88] sm:$0xff] }
  0x22   : > { %575 = vmatpush.msra.mxu0 %v527_v29  ;;  %607 = vmatpush.msra.mxu1 %v1120_v30  ;;  %v1105_v44 = vld [vmem:[%s2000_s3 + $0x40] sm:$0xff]  ;;  %v1154_v49 = vld [vmem:[%s2002_s5 + $0x1f0] sm:$0xff]  ;;  %v1155_v50 = vld [vmem:[%s2002_s5 + $0x1f8] sm:$0xff] }
  0x23   : > { %463 = vmatpush.msrb.mxu2 %v1100_v14  ;;  %552 = vmatpush.msrb.mxu3 %v1110_v28  ;;  %v522_v46 = vld [vmem:[%s2000_s3] sm:$0xff]  ;;  %v1153_v52 = vld [vmem:[%s2002_s5 + $0x1e8] sm:$0xff]  ;;  %v1150_v53 = vld [vmem:[%s2002_s5 + $0x1d0] sm:$0xff] }
  0x24   : > { %576 = vmatpush.msra.mxu0 %v526_v32  ;;  %608 = vmatpush.msra.mxu1 %v1119_v33  ;;  %v1115_v47 = vld [vmem:[%s2000_s3 + $0x80] sm:$0xff]  ;;  %v1151_v54 = vld [vmem:[%s2002_s5 + $0x1d8] sm:$0xff]  ;;  %v1149_v58 = vld [vmem:[%s2002_s5 + $0x1c8] sm:$0xff] }
  0x25   : > { %464 = vmatpush.msrb.mxu2 %v1099_v15  ;;  %553 = vmatpush.msrb.mxu3 %v1109_v31  ;;  %v1152_v51 = vld [vmem:[%s2002_s5 + $0x1e0] sm:$0xff]  ;;  %v1146_v61 = vld [vmem:[%s2002_s5 + $0x1b0] sm:$0xff]  ;;  %v1147_v62 = vld [vmem:[%s2002_s5 + $0x1b8] sm:$0xff] }
  0x26   : > { %1095 = vmatmul.msk.f32.gmra.mxu2 %vm379_vm0, %v365_v16  ;;  %1097 = vmatmul.msk.f32.gmra.mxu3 %vm379_vm0, %v363_v17  ;;  %v1245_v56 = vld [vmem:[%s1999_s2] ss:$0 sm:$0xff]  ;;  %v1145_v1 = vld [vmem:[%s2002_s5 + $0x1a8] sm:$0xff]  ;;  %v690_v2 = vld [vmem:[%s2002_s5 + $0xf0] sm:$0xff] }
  0x27   : > { %465 = vmatpush.msrb.mxu2 %v1098_v18  ;;  %554 = vmatpush.msrb.mxu3 %v1108_v35  ;;  %v1148_v57 = vld [vmem:[%s2002_s5 + $0x1c0] sm:$0xff]  ;;  %v691_v3 = vld [vmem:[%s2002_s5 + $0xf8] sm:$0xff]  ;;  %v689_v6 = vld [vmem:[%s2002_s5 + $0xe8] sm:$0xff] }
  0x28   : > { %577 = vmatpush.msra.mxu0 %v525_v36  ;;  %609 = vmatpush.msra.mxu1 %v1118_v37  ;;  %v1144_v63 = vld [vmem:[%s2002_s5 + $0x1a0] sm:$0xff]  ;;  %v1142_v8 = vld [vmem:[%s2002_s5 + $0x190] sm:$0xff]  ;;  %v1143_v9 = vld [vmem:[%s2002_s5 + $0x198] sm:$0xff] }
  0x29   : > { %555 = vmatpush.msrb.mxu3 %v1107_v38  ;;  %725 = vmatpush.msra.mxu2 %v1154_v49  ;;  %v688_v5 = vld [vmem:[%s2002_s5 + $0xe0] sm:$0xff]  ;;  %v686_v10 = vld [vmem:[%s2002_s5 + $0xd0] sm:$0xff]  ;;  %v687_v11 = vld [vmem:[%s2002_s5 + $0xd8] sm:$0xff] }
  0x2a   : > { %578 = vmatpush.msra.mxu0 %v524_v39  ;;  %610 = vmatpush.msra.mxu1 %v1117_v40  ;;  %v1140_v13 = vld [vmem:[%s2002_s5 + $0x180] sm:$0xff]  ;;  %v1141_v14 = vld [vmem:[%s2002_s5 + $0x188] sm:$0xff]  ;;  %v1139_v21 = vld [vmem:[%s2002_s5 + $0x178] sm:$0xff] }
  0x2b   : > { %556 = vmatpush.msrb.mxu3 %v1106_v41  ;;  %726 = vmatpush.msra.mxu2 %v1152_v51  ;;  %v684_v16 = vld [vmem:[%s2002_s5 + $0xc0] sm:$0xff]  ;;  %v685_v17 = vld [vmem:[%s2002_s5 + $0xc8] sm:$0xff]  ;;  %v1134_v27 = vld [vmem:[%s2002_s5 + $0x150] sm:$0xff] }
  0x2c   : > { %579 = vmatpush.msra.mxu0 %v523_v42  ;;  %611 = vmatpush.msra.mxu1 %v1116_v43  ;;  %v1136_v23 = vld [vmem:[%s2002_s5 + $0x160] sm:$0xff]  ;;  %v1137_v24 = vld [vmem:[%s2002_s5 + $0x168] sm:$0xff]  ;;  %v1135_v28 = vld [vmem:[%s2002_s5 + $0x158] sm:$0xff] }
  0x2d   : > { %557 = vmatpush.msrb.mxu3 %v1105_v44  ;;  %727 = vmatpush.msra.mxu2 %v1150_v53  ;;  %v1132_v29 = vld [vmem:[%s2002_s5 + $0x140] sm:$0xff]  ;;  %v1133_v30 = vld [vmem:[%s2002_s5 + $0x148] sm:$0xff]  ;;  %v1130_v32 = vld [vmem:[%s2002_s5 + $0x130] sm:$0xff] }
  0x2e   : > { %1103 = vmatmul.msk.f32.vlgmr.msrb.gmra.mxu2 %vm379_vm0, %v366_v19  ;;  %580 = vmatpush.msra.mxu0 %v522_v46  ;;  %v500_v19 = vlaneseq  ;;  %v1131_v33 = vld [vmem:[%s2002_s5 + $0x138] sm:$0xff]  ;;  %v1129_v35 = vld [vmem:[%s2002_s5 + $0x128] sm:$0xff]  ;;  %v1126_v38 = vld [vmem:[%s2002_s5 + $0x110] sm:$0xff] }
  0x2f   : > { %612 = vmatpush.msra.mxu1 %v1115_v47  ;;  %745 = vmatpush.msra.mxu3 %v1155_v50  ;;  %v1127_v39 = vld [vmem:[%s2002_s5 + $0x118] sm:$0xff]  ;;  %v1124_v51 = vld [vmem:[%s2002_s5 + $0x100] sm:$0xff]  ;;  %v682_v53 = vld [vmem:[%s2002_s5 + $0xb0] sm:$0xff] }
  0x30   : > { %728 = vmatpush.msra.mxu2 %v1148_v57  ;;  %765 = vmatpush.msrb.mxu0 %v690_v2  ;;  %v1633_v26 = vshrl.u32 %v500_v19, 7  ;;  %v680_v57 = vld [vmem:[%s2002_s5 + $0xa0] sm:$0xff]  ;;  %v677_v2 = vld [vmem:[%s2002_s5 + $0x88] sm:$0xff] }
  0x31   : > { %746 = vmatpush.msra.mxu3 %v1153_v52  ;;  %785 = vmatpush.msrb.mxu1 %v691_v3  ;;  %v1125_v52 = vld [vmem:[%s2002_s5 + $0x108] sm:$0xff]  ;;  %v1184_v3 = vld [vmem:[%s2002_s5 + $0x2c0] sm:$0xff] }
  0x32   : > { %729 = vmatpush.msra.mxu2 %v1146_v61  ;;  %766 = vmatpush.msrb.mxu0 %v688_v5  ;;  %v506_v31 = vand.u32 7, %v1633_v26  ;;  %v678_v61 = vld [vmem:[%s2002_s5 + $0x90] sm:$0xff]  ;;  %v1176_v19 = vld [vmem:[%s2002_s5 + $0x280] sm:$0xff]  ;;  %v1169_v37 = vld [vmem:[%s2002_s5 + $0x248] sm:$0xff] }
  0x33   : > { %747 = vmatpush.msra.mxu3 %v1151_v54  ;;  %786 = vmatpush.msrb.mxu1 %v689_v6  ;;  %v683_v54 = vld [vmem:[%s2002_s5 + $0xb8] sm:$0xff]  ;;  %v674_v5 = vld [vmem:[%s2002_s5 + $0x70] sm:$0xff]  ;;  %v1168_v36 = vld [vmem:[%s2002_s5 + $0x240] sm:$0xff] }
  0x34   : > { %730 = vmatpush.msra.mxu2 %v1144_v63  ;;  %767 = vmatpush.msrb.mxu0 %v686_v10  ;;  %vm1661_vm2 = vcmp.eq.s32.totalorder %v506_v31, 0  ;;  %vm1665_vm3 = vcmp.eq.s32.totalorder %v506_v31, 7  ;;  %v1186_v63 = vld [vmem:[%s2002_s5 + $0x2d0] sm:$0xff]  ;;  %v675_v6 = vld [vmem:[%s2002_s5 + $0x78] sm:$0xff]  ;;  %v673_v10 = vld [vmem:[%s2002_s5 + $0x68] sm:$0xff] }
  0x35   : > { %748 = vmatpush.msra.mxu3 %v1149_v58  ;;  %787 = vmatpush.msrb.mxu1 %v687_v11  ;;  %v681_v58 = vld [vmem:[%s2002_s5 + $0xa8] sm:$0xff]  ;;  %v1180_v11 = vld [vmem:[%s2002_s5 + $0x2a0] sm:$0xff]  ;;  %v663_v31 = vld [vmem:[%s2002_s5 + $0x18] sm:$0xff] }
  0x36   : > { %1104 = vmatmul.msk.f32.gmra.mxu2 %vm379_vm0, %v367_v20  ;;  %v1138_v20 = vld [vmem:[%s2002_s5 + $0x170] sm:$0xff]  ;;  %768 = vmatpush.msrb.mxu0 %v684_v16  ;;  %v1179_v16 = vld [vmem:[%s2002_s5 + $0x298] sm:$0xff] }
  0x37   : > { %749 = vmatpush.msra.mxu3 %v1147_v62  ;;  %731 = vmatpush.msra.mxu2 %v1142_v8  ;;  %v679_v62 = vld [vmem:[%s2002_s5 + $0x98] sm:$0xff] }
  0x38   : > { %788 = vmatpush.msrb.mxu1 %v685_v17  ;;  %769 = vmatpush.msrb.mxu0 %v682_v53  ;;  %v1183_v8 = vld [vmem:[%s2002_s5 + $0x2b8] sm:$0xff]  ;;  %v668_v17 = vld [vmem:[%s2002_s5 + $0x40] sm:$0xff] }
  0x39   : > { %750 = vmatpush.msra.mxu3 %v1145_v1  ;;  %732 = vmatpush.msra.mxu2 %v1140_v13  ;;  %v676_v1 = vld [vmem:[%s2002_s5 + $0x80] sm:$0xff]  ;;  %v670_v13 = vld [vmem:[%s2002_s5 + $0x50] sm:$0xff] }
  0x3a   : > { %789 = vmatpush.msrb.mxu1 %v683_v54  ;;  %770 = vmatpush.msrb.mxu0 %v680_v57  ;;  %v644_v54 = vand.u32 3, %v1633_v26  ;;  %v880_v26 = vld [vmem:[%s2003_s6] sm:$0x3] }
  0x3b   : > { %751 = vmatpush.msra.mxu3 %v1143_v9  ;;  %733 = vmatpush.msra.mxu2 %v1138_v20  ;;  %v672_v9 = vld [vmem:[%s2002_s5 + $0x60] sm:$0xff]  ;;  %v1177_v20 = vld [vmem:[%s2002_s5 + $0x288] sm:$0xff] }
  0x3c   : > { %790 = vmatpush.msrb.mxu1 %v681_v58  ;;  %771 = vmatpush.msrb.mxu0 %v678_v61  ;;  %vm1202_vm4 = vcmp.ne.s32.totalorder %v644_v54, 0  ;;  %vm1203_vm5 = vcmp.ne.s32.totalorder %v644_v54, 3 }
  0x3d   : > { %752 = vmatpush.msra.mxu3 %v1141_v14  ;;  %734 = vmatpush.msra.mxu2 %v1136_v23  ;;  %v671_v14 = vld [vmem:[%s2002_s5 + $0x58] sm:$0xff]  ;;  %v1174_v23 = vld [vmem:[%s2002_s5 + $0x270] sm:$0xff] }
  0x3e   : > { %791 = vmatpush.msrb.mxu1 %v679_v62  ;;  %772 = vmatpush.msrb.mxu0 %v676_v1 }
  0x3f   : > { %753 = vmatpush.msra.mxu3 %v1139_v21  ;;  %735 = vmatpush.msra.mxu2 %v1134_v27  ;;  %v666_v21 = vld [vmem:[%s2002_s5 + $0x30] sm:$0xff]  ;;  %v665_v27 = vld [vmem:[%s2002_s5 + $0x28] sm:$0xff] }
  0x40   : > { %792 = vmatpush.msrb.mxu1 %v677_v2  ;;  %773 = vmatpush.msrb.mxu0 %v674_v5 }
  0x41   : > { %754 = vmatpush.msra.mxu3 %v1137_v24  ;;  %736 = vmatpush.msra.mxu2 %v1132_v29  ;;  %v1175_v24 = vld [vmem:[%s2002_s5 + $0x278] sm:$0xff]  ;;  %v1173_v29 = vld [vmem:[%s2002_s5 + $0x268] sm:$0xff] }
  0x42   : > { %793 = vmatpush.msrb.mxu1 %v675_v6  ;;  %774 = vmatpush.msrb.mxu0 %v672_v9  ;;  %v882_v6 = vperm.slane %v880_v26, 0 }
  0x43   : > { %755 = vmatpush.msra.mxu3 %v1135_v28  ;;  %737 = vmatpush.msra.mxu2 %v1130_v32  ;;  %v1172_v28 = vld [vmem:[%s2002_s5 + $0x260] sm:$0xff]  ;;  %v1170_v32 = vld [vmem:[%s2002_s5 + $0x250] sm:$0xff] }
  0x44   : > { %794 = vmatpush.msrb.mxu1 %v673_v10  ;;  %775 = vmatpush.msrb.mxu0 %v670_v13 }
  0x45   : > { %756 = vmatpush.msra.mxu3 %v1133_v30  ;;  %v662_v30 = vld [vmem:[%s2002_s5 + $0x10] sm:$0xff] }
  0x46   : > { %795 = vmatpush.msrb.mxu1 %v671_v14  ;;  %776 = vmatpush.msrb.mxu0 %v668_v17  ;;  %v957_v17 = vld [vmem:[%s2004_s7 + $0x78] sm:$0xff] }
  0x47   : > { %757 = vmatpush.msra.mxu3 %v1131_v33  ;;  %v1171_v33 = vld [vmem:[%s2002_s5 + $0x258] sm:$0xff] }
  0x48   : > { %777 = vmatpush.msrb.mxu0 %v666_v21  ;;  %v955_v21 = vld [vmem:[%s2004_s7 + $0x68] sm:$0xff] }
  0x49   : > { %758 = vmatpush.msra.mxu3 %v1129_v35  ;;  %v661_v35 = vld [vmem:[%s2002_s5 + $0x8] sm:$0xff] }
  0x4b   : > { %759 = vmatpush.msra.mxu3 %v1127_v39  ;;  %v1167_v39 = vld [vmem:[%s2002_s5 + $0x238] sm:$0xff] }
  0x4d   : > { %760 = vmatpush.msra.mxu3 %v1125_v52 }
  0xa1   : > { %v403_v34 = vpop.f32.mrf.mxu2  ;;  %v432_v48 = vpop.f32.mrf.mxu3 }
  0xa2   : > { %v433_v55 = vadd.f32 %v432_v48, %v403_v34  ;;  %v1128_v34 = vld [vmem:[%s2002_s5 + $0x120] sm:$0xff] }
  0xa3   : > { %738 = vmatpush.msra.mxu2 %v1128_v34  ;;  %v660_v34 = vld [vmem:[%s2002_s5] sm:$0xff] }
  0xa5   : > { %739 = vmatpush.msra.mxu2 %v1126_v38  ;;  %v1166_v38 = vld [vmem:[%s2002_s5 + $0x230] sm:$0xff] }
  0xa7   : > { %740 = vmatpush.msra.mxu2 %v1124_v51 }
  0xa9   : > { %v406_v45 = vpop.f32.mrf.mxu2  ;;  %v435_v4 = vpop.f32.mrf.mxu3 }
  0xaa   : > { %v436_v12 = vadd.f32 %v435_v4, %v406_v45  ;;  %v1185_v4 = vld [vmem:[%s2002_s5 + $0x2c8] sm:$0xff] }
  0xb1   : > { %v467_v59 = vpop.f32.mrf.mxu2 }
  0xb2   : > { %v473_v60 = vadd.f32 %v467_v59, %v433_v55  ;;  %v1190_v55 = vld [vmem:[%s2002_s5 + $0x2f0] sm:$0xff]  ;;  %v1188_v59 = vld [vmem:[%s2002_s5 + $0x2e0] sm:$0xff] }
  0xb3   : > { %838 = vmatpush.msrb.mxu2 %v1190_v55 }
  0xb4   : > { %v479_v0 = vadd.f32 %v1245_v56, %v473_v60  ;;  %v1189_v60 = vld [vmem:[%s2002_s5 + $0x2e8] sm:$0xff] }
  0xb5   : > { %839 = vmatpush.msrb.mxu2 %v1188_v59 }
  0xb6   : > { %v481_v7 = vmax.f32 %v479_v0, 0.0  ;;  %v1187_v0 = vld [vmem:[%s2002_s5 + $0x2d8] sm:$0xff] }
  0xb7   : > { %840 = vmatpush.msrb.mxu2 %v1186_v63 }
  0xb8   : > { %483 = vst.msk [vmem:[#allocation2 + $0x8] sm:$0xff] %vm357_vm1, %v481_v7  ;;  %v1182_v7 = vld [vmem:[%s2002_s5 + $0x2b0] sm:$0xff] }
  0xb9   : > { %v470_v15 = vpop.f32.mrf.mxu2  ;;  %841 = vmatpush.msrb.mxu2 %v1184_v3 }
  0xba   : > { %v474_v18 = vadd.f32 %v470_v15, %v436_v12  ;;  %v1181_v12 = vld [vmem:[%s2002_s5 + $0x2a8] sm:$0xff]  ;;  %v1178_v15 = vld [vmem:[%s2002_s5 + $0x290] sm:$0xff] }
  0xbb   : > { %842 = vmatpush.msrb.mxu2 %v1182_v7  ;;  %v883_v7 = vperm.slane %v880_v26, 1 }
  0xbc   : > { %v480_v22 = vadd.f32 %v1245_v56, %v474_v18  ;;  %v1191_v56 = vld [vmem:[%s2002_s5 + $0x2f8] sm:$0xff]  ;;  %v669_v18 = vld [vmem:[%s2002_s5 + $0x48] sm:$0xff] }
  0xbd   : > { %843 = vmatpush.msrb.mxu2 %v1180_v11  ;;  %796 = vmatpush.msrb.mxu1 %v669_v18  ;;  %v973_v18 = vld [vmem:[%s2004_s7 + $0xf8] sm:$0xff] }
  0xbe   : > { %v482_v25 = vmax.f32 %v480_v22, 0.0  ;;  %v667_v22 = vld [vmem:[%s2002_s5 + $0x38] sm:$0xff] }
  0xbf   : > { %844 = vmatpush.msrb.mxu2 %v1178_v15  ;;  %797 = vmatpush.msrb.mxu1 %v667_v22  ;;  %v971_v22 = vld [vmem:[%s2004_s7 + $0xe8] sm:$0xff] }
  0xc0   : > { %484 = vst.msk [vmem:[#allocation2 + $0x10] sm:$0xff] %vm357_vm1, %v482_v25  ;;  %v664_v25 = vld [vmem:[%s2002_s5 + $0x20] sm:$0xff] }
  0xc1   : > { %845 = vmatpush.msrb.mxu2 %v1176_v19  ;;  %778 = vmatpush.msrb.mxu0 %v664_v25  ;;  %v956_v19 = vld [vmem:[%s2004_s7 + $0x70] sm:$0xff]  ;;  %v953_v25 = vld [vmem:[%s2004_s7 + $0x58] sm:$0xff] }
  0xc2   : > { %798 = vmatpush.msrb.mxu1 %v665_v27  ;;  %v969_v27 = vld [vmem:[%s2004_s7 + $0xd8] sm:$0xff] }
  0xc3   : > { %846 = vmatpush.msrb.mxu2 %v1174_v23  ;;  %779 = vmatpush.msrb.mxu0 %v662_v30  ;;  %v954_v23 = vld [vmem:[%s2004_s7 + $0x60] sm:$0xff]  ;;  %v951_v30 = vld [vmem:[%s2004_s7 + $0x48] sm:$0xff] }
  0xc4   : > { %799 = vmatpush.msrb.mxu1 %v663_v31  ;;  %v967_v31 = vld [vmem:[%s2004_s7 + $0xc8] sm:$0xff] }
  0xc5   : > { %847 = vmatpush.msrb.mxu2 %v1172_v28  ;;  %780 = vmatpush.msrb.mxu0 %v660_v34  ;;  %v952_v28 = vld [vmem:[%s2004_s7 + $0x50] sm:$0xff]  ;;  %v949_v34 = vld [vmem:[%s2004_s7 + $0x38] sm:$0xff] }
  0xc6   : > { %800 = vmatpush.msrb.mxu1 %v661_v35  ;;  %v965_v35 = vld [vmem:[%s2004_s7 + $0xb8] sm:$0xff] }
  0xc7   : > { %v486_v40 = vld [vmem:[#allocation2 + $0x8] ss:$2 sm:$0xff]  ;;  %v488_v41 = vld [vmem:[#allocation2 + $0x9] ss:$2 sm:$0xff]  ;;  %848 = vmatpush.msrb.mxu2 %v1170_v32  ;;  %v950_v32 = vld [vmem:[%s2004_s7 + $0x40] sm:$0xff] }
  0xc8   : > { %v491_v42 = vld [vmem:[#allocation2 + $0x6] ss:$2 sm:$0xff]  ;;  %v489_v43 = vmax.f32 %v486_v40, %v488_v41  ;;  %v493_v44 = vld [vmem:[#allocation2 + $0x7] ss:$2 sm:$0xff] }
  0xc9   : > { %v496_v45 = vld [vmem:[#allocation2 + $0xa] ss:$2 sm:$0xff]  ;;  %v498_v46 = vld [vmem:[#allocation2 + $0xb] ss:$2 sm:$0xff]  ;;  %v494_v47 = vmax.f32 %v491_v42, %v493_v44  ;;  %849 = vmatpush.msrb.mxu2 %v1168_v36  ;;  %v1164_v40 = vld [vmem:[%s2002_s5 + $0x220] sm:$0xff] }
  0xca   : > { %v499_v48 = vmax.f32 %v496_v45, %v498_v46  ;;  %1113 = vmatmul.msk.f32.vlgmr.msrb.gmra.mxu3 %vm357_vm1, %v489_v43  ;;  %v1165_v41 = vld [vmem:[%s2002_s5 + $0x228] sm:$0xff]  ;;  %v1162_v42 = vld [vmem:[%s2002_s5 + $0x210] sm:$0xff]  ;;  %v1163_v43 = vld [vmem:[%s2002_s5 + $0x218] sm:$0xff] }
  0xcb   : > { %v517_v49 = vsel %vm1661_vm2, 0.0, %v494_v47  ;;  %858 = vmatpush.msrb.mxu3 %v1191_v56  ;;  %850 = vmatpush.msrb.mxu2 %v1166_v38  ;;  %v1160_v44 = vld [vmem:[%s2002_s5 + $0x200] sm:$0xff]  ;;  %v1161_v45 = vld [vmem:[%s2002_s5 + $0x208] sm:$0xff]  ;;  %v948_v36 = vld [vmem:[%s2004_s7 + $0x30] sm:$0xff] }
  0xcc   : > { %v521_v50 = vsel %vm1665_vm3, 0.0, %v499_v48  ;;  %1114 = vmatmul.msk.f32.vlgmr.msra.gmra.mxu0 %vm357_vm1, %v517_v49  ;;  %v1246_v49 = vld [vmem:[%s2001_s4] ss:$0 sm:$0xff]  ;;  %v947_v38 = vld [vmem:[%s2004_s7 + $0x28] sm:$0xff] }
  0xcd   : > { %1123 = vmatmul.msk.f32.vlgmr.msra.gmra.mxu1 %vm357_vm1, %v521_v50  ;;  %859 = vmatpush.msrb.mxu3 %v1189_v60 }
  0xce   : > { %851 = vmatpush.msrb.mxu2 %v1164_v40  ;;  %v946_v40 = vld [vmem:[%s2004_s7 + $0x20] sm:$0xff] }
  0xcf   : > { %860 = vmatpush.msrb.mxu3 %v1187_v0 }
  0xd0   : > { %852 = vmatpush.msrb.mxu2 %v1162_v42  ;;  %v945_v42 = vld [vmem:[%s2004_s7 + $0x18] sm:$0xff] }
  0xd1   : > { %861 = vmatpush.msrb.mxu3 %v1185_v4 }
  0xd2   : > { %853 = vmatpush.msrb.mxu2 %v1160_v44  ;;  %v944_v44 = vld [vmem:[%s2004_s7 + $0x10] sm:$0xff] }
  0xd3   : > { %862 = vmatpush.msrb.mxu3 %v1183_v8 }
  0xd5   : > { %863 = vmatpush.msrb.mxu3 %v1181_v12 }
  0xd7   : > { %864 = vmatpush.msrb.mxu3 %v1179_v16  ;;  %v890_v16 = vld [vmem:[%s2006_s9] sm:$0x1] }
  0xd9   : > { %865 = vmatpush.msrb.mxu3 %v1177_v20  ;;  %v972_v20 = vld [vmem:[%s2004_s7 + $0xf0] sm:$0xff] }
  0xdb   : > { %866 = vmatpush.msrb.mxu3 %v1175_v24  ;;  %v970_v24 = vld [vmem:[%s2004_s7 + $0xe0] sm:$0xff] }
  0xdd   : > { %867 = vmatpush.msrb.mxu3 %v1173_v29  ;;  %v968_v29 = vld [vmem:[%s2004_s7 + $0xd0] sm:$0xff] }
  0xdf   : > { %868 = vmatpush.msrb.mxu3 %v1171_v33  ;;  %v966_v33 = vld [vmem:[%s2004_s7 + $0xc0] sm:$0xff] }
  0xe1   : > { %869 = vmatpush.msrb.mxu3 %v1169_v37  ;;  %v964_v37 = vld [vmem:[%s2004_s7 + $0xb0] sm:$0xff] }
  0xe3   : > { %870 = vmatpush.msrb.mxu3 %v1167_v39  ;;  %v963_v39 = vld [vmem:[%s2004_s7 + $0xa8] sm:$0xff] }
  0xe5   : > { %871 = vmatpush.msrb.mxu3 %v1165_v41  ;;  %v962_v41 = vld [vmem:[%s2004_s7 + $0xa0] sm:$0xff] }
  0xe7   : > { %872 = vmatpush.msrb.mxu3 %v1163_v43  ;;  %v961_v43 = vld [vmem:[%s2004_s7 + $0x98] sm:$0xff] }
  0xe9   : > { %873 = vmatpush.msrb.mxu3 %v1161_v45  ;;  %v960_v45 = vld [vmem:[%s2004_s7 + $0x90] sm:$0xff] }
 0x149   : > { %v582_v46 = vpop.f32.mrf.mxu0 }
 0x14a   : > { %v614_v50 = vpop.f32.mrf.mxu1 }
 0x14d   : > { %v559_v47 = vpop.f32.mrf.mxu3 }
 0x14e   : > { %v583_v48 = vadd.f32 %v582_v46, %v559_v47  ;;  %v943_v46 = vld [vmem:[%s2004_s7 + $0x8] sm:$0xff]  ;;  %v942_v47 = vld [vmem:[%s2004_s7] sm:$0xff] }
 0x150   : > { %v617_v51 = vadd.f32 %v614_v50, %v583_v48  ;;  %v959_v48 = vld [vmem:[%s2004_s7 + $0x88] sm:$0xff] }
 0x152   : > { %v622_v52 = vadd.f32 %v1246_v49, %v617_v51  ;;  %v958_v49 = vld [vmem:[%s2004_s7 + $0x80] sm:$0xff] }
 0x154   : > { %v623_v53 = vmax.f32 %v622_v52, 0.0  ;;  %v974_v52 = vld [vmem:[%s2005_s8] sm:$0x1] }
 0x156   : > { %624 = vst [vmem:[#allocation3 + $0x8] sm:$0xff] %v623_v53 }
 0x15d   : > { %v626_v55 = vld [vmem:[#allocation3 + $0x8] ss:$2 sm:$0xf]  ;;  %v628_v56 = vld [vmem:[#allocation3 + $0x9] ss:$2 sm:$0xf] }
 0x15e   : > { %v629_v57 = vmax.f32 %v626_v55, %v628_v56  ;;  %v631_v58 = vld [vmem:[#allocation3 + $0x6] ss:$2 sm:$0xf]  ;;  %v633_v59 = vld [vmem:[#allocation3 + $0x7] ss:$2 sm:$0xf] }
 0x15f   : > { %v634_v60 = vmax.f32 %v631_v58, %v633_v59  ;;  %v636_v61 = vld [vmem:[#allocation3 + $0xa] ss:$2 sm:$0xf]  ;;  %v638_v62 = vld [vmem:[#allocation3 + $0xb] ss:$2 sm:$0xf] }
 0x160   : > { %741 = vmatmul.f32.vlgmr.msra.gmra.mxu2 %v629_v57  ;;  %761 = vmatmul.f32.vlgmr.msra.gmra.mxu3 %v629_v57  ;;  %v639_v63 = vmax.f32 %v636_v61, %v638_v62 }
 0x161   : > { %1157 = vmatmul.msk.f32.vlgmr.msrb.gmra.mxu0 %vm1202_vm4, %v634_v60  ;;  %1159 = vmatmul.msk.f32.vlgmr.msrb.gmra.mxu1 %vm1202_vm4, %v634_v60 }
 0x168   : > { %1193 = vmatmul.msk.f32.vlgmr.msrb.gmra.mxu2 %vm1203_vm5, %v639_v63  ;;  %1195 = vmatmul.msk.f32.vlgmr.msrb.gmra.mxu3 %vm1203_vm5, %v639_v63 }
 0x1de   : > { %v782_v2 = vpop.f32.mrf.mxu0  ;;  %v802_v3 = vpop.f32.mrf.mxu1 }
 0x1e3   : > { %v742_v0 = vpop.f32.mrf.mxu2  ;;  %v762_v1 = vpop.f32.mrf.mxu3 }
 0x1e4   : > { %v783_v4 = vadd.f32 %v782_v2, %v742_v0  ;;  %v803_v5 = vadd.f32 %v802_v3, %v762_v1 }
 0x1eb   : > { %v855_v8 = vpop.f32.mrf.mxu2  ;;  %v875_v9 = vpop.f32.mrf.mxu3 }
 0x1ec   : > { %v878_v10 = vadd.f32 %v855_v8, %v783_v4  ;;  %v879_v11 = vadd.f32 %v875_v9, %v803_v5 }
 0x1ee   : > { %v886_v12 = vadd.f32 %v882_v6, %v878_v10  ;;  %v887_v13 = vadd.f32 %v883_v7, %v879_v11 }
 0x1f0   : > { %v888_v14 = vmax.f32 %v886_v12, 0.0  ;;  %v889_v15 = vmax.f32 %v887_v13, 0.0 }
 0x1f2   : > { %1196 = vmatpush.msk.msra.mxu0 %vm895_vm6, %v888_v14  ;;  %1198 = vmatpush.msk.msra.mxu1 %vm895_vm6, %v889_v15 }
 0x1f3   : > { %1197 = vmatmul.msk.f32.vlgmr.msra.gmra.mxu0 %vm891_vm7, %v890_v16  ;;  %1199 = vmatmul.msk.f32.vlgmr.msra.gmra.mxu1 %vm891_vm7, %v890_v16 }
 0x1f4   : > { %975 = vmatpush.msrb.mxu0 %v957_v17  ;;  %995 = vmatpush.msrb.mxu1 %v973_v18 }
 0x1f6   : > { %976 = vmatpush.msrb.mxu0 %v956_v19  ;;  %996 = vmatpush.msrb.mxu1 %v972_v20 }
 0x1f8   : > { %977 = vmatpush.msrb.mxu0 %v955_v21  ;;  %997 = vmatpush.msrb.mxu1 %v971_v22 }
 0x1fa   : > { %978 = vmatpush.msrb.mxu0 %v954_v23  ;;  %998 = vmatpush.msrb.mxu1 %v970_v24 }
 0x1fc   : > { %979 = vmatpush.msrb.mxu0 %v953_v25  ;;  %999 = vmatpush.msrb.mxu1 %v969_v27 }
 0x1fe   : > { %980 = vmatpush.msrb.mxu0 %v952_v28  ;;  %1000 = vmatpush.msrb.mxu1 %v968_v29 }
 0x200   : > { %981 = vmatpush.msrb.mxu0 %v951_v30  ;;  %1001 = vmatpush.msrb.mxu1 %v967_v31 }
 0x202   : > { %982 = vmatpush.msrb.mxu0 %v950_v32  ;;  %1002 = vmatpush.msrb.mxu1 %v966_v33 }
 0x204   : > { %983 = vmatpush.msrb.mxu0 %v949_v34  ;;  %1003 = vmatpush.msrb.mxu1 %v965_v35 }
 0x206   : > { %984 = vmatpush.msrb.mxu0 %v948_v36  ;;  %1004 = vmatpush.msrb.mxu1 %v964_v37 }
 0x208   : > { %985 = vmatpush.msrb.mxu0 %v947_v38  ;;  %1005 = vmatpush.msrb.mxu1 %v963_v39 }
 0x20a   : > { %986 = vmatpush.msrb.mxu0 %v946_v40  ;;  %1006 = vmatpush.msrb.mxu1 %v962_v41 }
 0x20c   : > { %987 = vmatpush.msrb.mxu0 %v945_v42  ;;  %1007 = vmatpush.msrb.mxu1 %v961_v43 }
 0x20e   : > { %988 = vmatpush.msrb.mxu0 %v944_v44  ;;  %1008 = vmatpush.msrb.mxu1 %v960_v45 }
 0x210   : > { %989 = vmatpush.msrb.mxu0 %v943_v46  ;;  %1009 = vmatpush.msrb.mxu1 %v959_v48 }
 0x212   : > { %990 = vmatpush.msrb.mxu0 %v942_v47  ;;  %1010 = vmatpush.msrb.mxu1 %v958_v49 }
 0x270   : > { %v919_v50 = vpop.f32.mrf.mxu0  ;;  %v939_v51 = vpop.f32.mrf.mxu1 }
 0x271   : > { %991 = vmatmul.f32.vlgmr.msrb.gmra.mxu0 %v919_v50  ;;  %1011 = vmatmul.f32.vlgmr.msrb.gmra.mxu1 %v939_v51 }
 0x2ee   : > { %v992_v53 = vpop.f32.mrf.mxu0  ;;  %v1012_v54 = vpop.f32.mrf.mxu1 }
 0x2ef   : > { %v993_v55 = vadd.f32 %v992_v53, %v974_v52 }
 0x2f1   : > { %v1013_v56 = vadd.f32 %v1012_v54, %v993_v55 }
 0x2f3   : > { %1015 = vst [vmem:[%s351_s22] sm:$0x1] %v1013_v56 }
 0x2f4   : > { %1274 = shalt.err (!%p1271_p3)
}
 0x2f5   : > { %1205 = dma.vmem_to_hbm [thread:$0]  (%p1405_p5), %s1028_s11, 16, %s1030_s12, %s1017_s18  }
 0x2f6 PF: > { %p1211_p4 = scmp.ge.s32.totalorder %s1309_s16, 2  ;;  %s1041_s25 = sand.u32 1, %s1297_s13  }
 0x2f7   : > { %s1042_s29 = scalar_lea.sflag [#allocation5], %s1041_s25 }
 0x2f8   : > { %p1208_p7 = pnand %p1211_p4, %p1409_p6 }
 0x2fa   : > { %p1209_p8 = pneg %p1208_p7 }
 0x2fc   : > { %1292 = dma.done.wait (%p1209_p8), %s1042_s29, 16  }
 0x2fd   : > { %1294 = vsyncadd (%p1209_p8), %s1042_s29, 4294967280  ;;  %s2015_s22 = sld [smem:[#allocation7_spill]]  ;;  %p20_p9 = scmp.ge.s32.totalorder %s1392_s19, 4  }
 0x2fe   : > { %s2016_s13 = smov %s1301_s14  ;;  %s2017_s14 = smov %s1305_s15 }
 0x2ff   : > { %s2019_s16 = smov %s1392_s19  ;;  %22 = sbr.rel (!%p20_p9) target bundleno = 3 (0x3), region = 113 }
 0x303   : > { %s2018_s15 = smov %s2015_s22 }
 0x304   :  { %1047 = vsyncpa [#allocation5], 1 }
 0x305   :  { %1049 = vsyncpa [#allocation5 + $0x1], 1 }

</bundles_post_ra>
